<compile_context>
chip_gen: v7x
topology: tpu7x:2x2x1
jax: 0.10.0
libtpu: 0.0.40
codegen_flags: <defaults>
</compile_context>

<pallas_src>
import jax
import jax.numpy as jnp
from jax.experimental import pallas as pl
from jax.experimental.pallas import tpu as pltpu


_VMEM_LIMIT = 32 * 1024 * 1024  # explicit scoped-VMEM budget (safe on v5e/v6e/v7x)


# ----------------------------------------------------------------------------
# Pallas kernels (fused multi-matmul stages, M-tiled)
# ----------------------------------------------------------------------------
def _rpn_kernel(patches_ref, wc_ref, bc_ref, wh_ref, bh_ref, out_ref):
    # 3x3 conv as im2col matmul (+bias, ReLU), then fused loc|cls 1x1 head.
    feat = jnp.dot(patches_ref[...], wc_ref[...],
                   preferred_element_type=jnp.float32)
    feat = jnp.maximum(feat + bc_ref[...], 0.0)
    head = jnp.dot(feat.astype(wh_ref.dtype), wh_ref[...],
                   preferred_element_type=jnp.float32)
    out_ref[...] = (head + bh_ref[...]).astype(out_ref.dtype)


def _boxhead_kernel(mask_ref, feat_ref, fcw_ref, fcb_ref, hw_ref, hb_ref, out_ref):
    # ROI average-pool as S*S accumulating mask matmuls against the raw
    # (B*H*W, C) feature map (no block-diagonal S^2 duplication), accumulated
    # directly into the FC activation, then ReLU and the fused loc|cls head.
    # Intermediates never leave vregs/VMEM.
    nbins = mask_ref.shape[0]
    C = feat_ref.shape[1]
    feat = feat_ref[...]                       # f32 (BHW, C)
    fcw = fcw_ref[...]                         # bf16 (S*S*C, hidden)
    h = jnp.zeros((mask_ref.shape[1], fcw.shape[1]), jnp.float32)
    for b in range(nbins):                     # static, fully unrolled
        pooled = jnp.dot(mask_ref[b], feat,    # f32 pooling for precision
                         preferred_element_type=jnp.float32)      # (tn, C)
        h = h + jnp.dot(pooled.astype(fcw.dtype), fcw[b * C:(b + 1) * C],
                        preferred_element_type=jnp.float32)       # (tn, hidden)
    h = jnp.maximum(h + fcb_ref[...], 0.0)
    out = jnp.dot(h.astype(hw_ref.dtype), hw_ref[...],
                  preferred_element_type=jnp.float32)
    out_ref[...] = (out + hb_ref[...]).astype(out_ref.dtype)


def _choose_tile_rows(M, cap_rows=2048):
    """Largest row tile that divides M, is a multiple of 8, stays under a
    conservative per-buffer VMEM budget (cap_rows), and leaves >=2 grid steps
    (pipelined DMA/compute overlap + v7x dual-TensorCore sharding).  Falls back
    to the full array (single step) when M cannot be split cleanly."""
    cands = [t for t in range(8, M + 1, 8)
             if M % t == 0 and t <= cap_rows and M // t >= 2]
    return max(cands) if cands else M


def _rpn_call(patches, wc, bc, wh, bh, nout_p):
    M, K = patches.shape
    tm = _choose_tile_rows(M)
    const = lambda i: (0, 0)
    return pl.pallas_call(
        _rpn_kernel,
        out_shape=jax.ShapeDtypeStruct((M, nout_p), jnp.bfloat16),
        grid_spec=pltpu.PrefetchScalarGridSpec(
            num_scalar_prefetch=0,
            grid=(M // tm,),
            in_specs=[
                pl.BlockSpec((tm, K), lambda i: (i, 0)),   # row-tiled activations
                pl.BlockSpec(wc.shape, const),             # resident weights
                pl.BlockSpec(bc.shape, const),
                pl.BlockSpec(wh.shape, const),
                pl.BlockSpec(bh.shape, const),
            ],
            out_specs=pl.BlockSpec((tm, nout_p), lambda i: (i, 0)),
        ),
        compiler_params=pltpu.CompilerParams(
            dimension_semantics=("parallel",),
            vmem_limit_bytes=_VMEM_LIMIT,
        ),
    )(patches, wc, bc, wh, bh)


def _boxhead_call(mask, feat, fcw, fcb, hw, hb, nout_p):
    nbins, Np, BHW = mask.shape
    tn = _choose_tile_rows(Np)
    const = lambda i: (0, 0)
    return pl.pallas_call(
        _boxhead_kernel,
        out_shape=jax.ShapeDtypeStruct((Np, nout_p), jnp.bfloat16),
        grid_spec=pltpu.PrefetchScalarGridSpec(
            num_scalar_prefetch=0,
            grid=(Np // tn,),
            in_specs=[
                pl.BlockSpec((nbins, tn, BHW), lambda i: (0, i, 0)),  # ROI-row tiled
                pl.BlockSpec(feat.shape, const),                      # resident feature
                pl.BlockSpec(fcw.shape, const),
                pl.BlockSpec(fcb.shape, const),
                pl.BlockSpec(hw.shape, const),
                pl.BlockSpec(hb.shape, const),
            ],
            out_specs=pl.BlockSpec((tn, nout_p), lambda i: (i, 0)),
        ),
        compiler_params=pltpu.CompilerParams(
            dimension_semantics=("parallel",),
            vmem_limit_bytes=_VMEM_LIMIT,
        ),
    )(mask, feat, fcw, fcb, hw, hb)


# ----------------------------------------------------------------------------
# Small helpers (glue, plain JAX)
# ----------------------------------------------------------------------------
def _round_up(x, m):
    return ((x + m - 1) // m) * m


def _pad_to(a, rows, cols):
    return jnp.zeros((rows, cols), a.dtype).at[: a.shape[0], : a.shape[1]].set(a)


def xyxy_to_cxcywh(b):
    x1, y1, x2, y2 = b[..., 0], b[..., 1], b[..., 2], b[..., 3]
    w = jnp.maximum(x2 - x1, 1e-3)
    h = jnp.maximum(y2 - y1, 1e-3)
    return jnp.stack([x1 + 0.5 * w, y1 + 0.5 * h, w, h], axis=-1)


def encode(anchors, boxes):
    a = xyxy_to_cxcywh(anchors)
    g = xyxy_to_cxcywh(boxes)
    dxy = (g[..., :2] - a[..., :2]) / a[..., 2:]
    dwh = jnp.log(g[..., 2:] / a[..., 2:])
    return jnp.concatenate([dxy, dwh], axis=-1)


def decode(anchors, deltas):
    a = xyxy_to_cxcywh(anchors)
    cxy = a[..., :2] + deltas[..., :2] * a[..., 2:]
    wh = a[..., 2:] * jnp.exp(jnp.clip(deltas[..., 2:], -4.0, 4.0))
    return jnp.concatenate([cxy - 0.5 * wh, cxy + 0.5 * wh], axis=-1)


def box_iou(a, b):
    area_a = jnp.maximum(a[:, 2] - a[:, 0], 0.0) * jnp.maximum(a[:, 3] - a[:, 1], 0.0)
    area_b = jnp.maximum(b[:, 2] - b[:, 0], 0.0) * jnp.maximum(b[:, 3] - b[:, 1], 0.0)
    lt = jnp.maximum(a[:, None, :2], b[None, :, :2])
    rb = jnp.minimum(a[:, None, 2:], b[None, :, 2:])
    wh = jnp.maximum(rb - lt, 0.0)
    inter = wh[..., 0] * wh[..., 1]
    union = area_a[:, None] + area_b[None, :] - inter
    return inter / jnp.maximum(union, 1e-6)


def make_anchors(H, W, sizes):
    ys = jnp.arange(H, dtype=jnp.float32) + 0.5
    xs = jnp.arange(W, dtype=jnp.float32) + 0.5
    cy, cx = jnp.meshgrid(ys, xs, indexing="ij")
    s = jnp.asarray(sizes, jnp.float32)
    half = 0.5 * s
    x1 = cx[..., None] - half
    y1 = cy[..., None] - half
    x2 = cx[..., None] + half
    y2 = cy[..., None] + half
    return jnp.stack([x1, y1, x2, y2], axis=-1).reshape(-1, 4)  # (H*W*A, 4)


def im2col_3x3(x):
    """x: (B,H,W,C) -> (B*H*W, 9*C).  No HBM K-padding: the full-array last
    block dim is exempt from the 128-lane rule, so patches ship at K=9*C."""
    B, H, W, C = x.shape
    xp = jnp.pad(x, ((0, 0), (1, 1), (1, 1), (0, 0)))
    patches = [xp[:, dy:dy + H, dx:dx + W, :] for dy in range(3) for dx in range(3)]
    return jnp.concatenate(patches, axis=-1).reshape(B * H * W, 9 * C)


# ----------------------------------------------------------------------------
# FasterRCNN (Pallas for the hot path, JAX glue elsewhere)
# ----------------------------------------------------------------------------
class FasterRCNN:
    LANE = 128

    def __init__(self, key, in_channels=16, rpn_channels=16, num_anchor=3,
                 roi_size=2, hidden=32, num_classes=3, feat_h=8, feat_w=8,
                 top_k=8):
        self.C = in_channels
        self.Cr = rpn_channels
        self.A = num_anchor
        self.S = roi_size
        self.hidden = hidden
        self.num_classes = num_classes
        self.H, self.W = feat_h, feat_w
        self.top_k = top_k
        self.anchors = make_anchors(feat_h, feat_w, [2.0, 3.0, 4.0])  # (H*W*A, 4)

        L = self.LANE
        self.kconv = 9 * self.C                               # 144 (true K, no pad)
        self.rpn_nout = self.A * 4 + self.A                   # fused loc|cls = 15
        self.rpn_nout_p = _round_up(self.rpn_nout, L)         # 128 (lane-dense out)
        self.pool_n = self.S * self.S * self.C                # 64 (true FC K, no pad)
        self.head_nout = 4 * num_classes + (num_classes + 1)  # fused loc|cls = 16
        self.head_nout_p = _round_up(self.head_nout, L)       # 128 (lane-dense out)

        ks = jax.random.split(key, 6)

        def w(k, shape):
            return jax.random.normal(k, shape, jnp.float32) * 0.05

        rpn_conv_w = w(ks[0], (self.kconv, self.Cr))
        rpn_loc_w = w(ks[1], (self.Cr, self.A * 4))
        rpn_cls_w = w(ks[2], (self.Cr, self.A))
        fc_w = w(ks[3], (self.pool_n, hidden))
        loc_w = w(ks[4], (hidden, 4 * num_classes))
        cls_w = w(ks[5], (hidden, num_classes + 1))

        # Fuse sibling heads along N; pre-pad (outputs only) & pre-cast ONCE.
        rpn_head_w = jnp.concatenate([rpn_loc_w, rpn_cls_w], axis=1)   # (Cr, 15)
        head_w = jnp.concatenate([loc_w, cls_w], axis=1)               # (hidden, 16)

        self.params = {
            "rpn_conv_w": rpn_conv_w.astype(jnp.bfloat16),             # (144, 16)
            "rpn_conv_b": jnp.zeros((1, self.Cr), jnp.float32),
            "rpn_head_w": _pad_to(rpn_head_w, self.Cr, self.rpn_nout_p).astype(jnp.bfloat16),
            "rpn_head_b": jnp.zeros((1, self.rpn_nout_p), jnp.float32),
            "fc_w": fc_w.astype(jnp.bfloat16),                         # (64, 32)
            "fc_b": jnp.zeros((1, hidden), jnp.float32),
            "head_w": _pad_to(head_w, hidden, self.head_nout_p).astype(jnp.bfloat16),
            "head_b": jnp.zeros((1, self.head_nout_p), jnp.float32),
        }

    # ---------------- match_anchors ----------------
    def match_anchors(self, image_gts):
        anchors = self.anchors

        def per_image(gts):
            boxes = gts[:, :4]
            iou = box_iou(anchors, boxes)             # (A_total, G)
            best_iou = iou.max(axis=1)
            best_gt = iou.argmax(axis=1)
            pos = best_iou >= 0.5
            ignore = (best_iou >= 0.3) & (~pos)
            matched = boxes[best_gt]
            loc_t = jnp.where(pos[:, None], encode(anchors, matched), 0.0)
            cls_t = pos.astype(jnp.int32)
            return loc_t, cls_t, ignore

        return jax.vmap(per_image)(image_gts)         # (B,A,4), (B,A), (B,A)

    # ---------------- rpn.region_proposal (one fused, M-tiled Pallas kernel) --
    def region_proposal(self, x_nhwc):
        p = self.params
        B, H, W, C = x_nhwc.shape
        patches = im2col_3x3(x_nhwc).astype(jnp.bfloat16)        # (B*H*W, 9*C)
        out = _rpn_call(patches, p["rpn_conv_w"], p["rpn_conv_b"],
                        p["rpn_head_w"], p["rpn_head_b"], self.rpn_nout_p)
        Atot = H * W * self.A
        rpn_loc_p = out[:, : self.A * 4].astype(jnp.float32).reshape(B, Atot, 4)
        rpn_cls_p = out[:, self.A * 4: self.A * 4 + self.A].astype(
            jnp.float32).reshape(B, Atot)

        boxes = decode(self.anchors[None], rpn_loc_p)            # (B,Atot,4)
        scores = jax.nn.sigmoid(rpn_cls_p)
        _, top_idx = jax.lax.top_k(scores, self.top_k)           # (B,R)
        top_boxes = jnp.take_along_axis(boxes, top_idx[..., None], axis=1)
        top_boxes = jnp.clip(top_boxes, 0.0,
                             jnp.array([W, H, W, H], jnp.float32))
        bidx = jnp.broadcast_to(
            jnp.arange(B, dtype=jnp.float32)[:, None], (B, self.top_k))
        rois = jnp.concatenate([bidx[..., None], top_boxes], axis=-1)
        rois = rois.reshape(B * self.top_k, 5)                   # [b,x1,y1,x2,y2]
        ps = [x_nhwc]
        return ps, rois, rpn_loc_p, rpn_cls_p

    # ---------------- roi_match ----------------
    def roi_match(self, rois, image_gts):
        B, G, _ = image_gts.shape
        roi_b = rois[:, 0].astype(jnp.int32)
        roi_boxes = rois[:, 1:5]
        gt_boxes = image_gts[:, :, :4].reshape(B * G, 4)
        gt_labels = image_gts[:, :, 4].reshape(B * G).astype(jnp.int32)
        gt_b = jnp.repeat(jnp.arange(B), G)

        iou = box_iou(roi_boxes, gt_boxes)                       # (N, B*G)
        same = roi_b[:, None] == gt_b[None, :]
        iou = jnp.where(same, iou, -1.0)
        best_iou = iou.max(axis=1)
        best_gt = iou.argmax(axis=1)
        pos = best_iou >= 0.5
        matched = gt_boxes[best_gt]
        loc_t = jnp.where(pos[:, None], encode(roi_boxes, matched), 0.0)
        cls_t = jnp.where(pos, gt_labels[best_gt], 0)
        return loc_t, cls_t, rois

    # ---------------- ROI-pool mask (glue) ----------------
    def _roi_pool_mask(self, rois, B, H, W, n_pad):
        """Average-pool weights, laid out bin-major: (S*S, n_pad, B*H*W) f32."""
        N = rois.shape[0]
        S = self.S
        rb = rois[:, 0].astype(jnp.int32)
        x1, y1, x2, y2 = rois[:, 1], rois[:, 2], rois[:, 3], rois[:, 4]
        bw = jnp.maximum(x2 - x1, 1e-3) / S
        bh = jnp.maximum(y2 - y1, 1e-3) / S
        ii = jnp.arange(S, dtype=jnp.float32)
        ylo = y1[:, None] + ii[None] * bh[:, None]
        yhi = ylo + bh[:, None]
        xlo = x1[:, None] + ii[None] * bw[:, None]
        xhi = xlo + bw[:, None]
        yc = jnp.arange(H, dtype=jnp.float32) + 0.5
        xc = jnp.arange(W, dtype=jnp.float32) + 0.5
        ymask = (yc[None, None, :] >= ylo[:, :, None]) & (yc[None, None, :] < yhi[:, :, None])
        xmask = (xc[None, None, :] >= xlo[:, :, None]) & (xc[None, None, :] < xhi[:, :, None])
        bmask = rb[:, None] == jnp.arange(B)[None, :]
        m = (ymask[:, :, None, None, :, None]
             & xmask[:, None, :, None, None, :]
             & bmask[:, None, None, :, None, None]).astype(jnp.float32)  # (N,S,S,B,H,W)
        cnt = m.sum(axis=(3, 4, 5), keepdims=True)
        m = m / jnp.maximum(cnt, 1.0)
        m = m.reshape(N, S * S, B * H * W).transpose(1, 0, 2)            # (S*S,N,BHW)
        if n_pad > N:
            m = jnp.pad(m, ((0, 0), (0, n_pad - N), (0, 0)))
        return m

    # ---------------- roi_pool + box_head (one fused, row-tiled Pallas kernel)
    def box_head(self, feat_nhwc, rois):
        p = self.params
        B, H, W, C = feat_nhwc.shape
        N = rois.shape[0]
        # Pad ROI rows to a full 128-row MXU tile so the matmul M is not a tiny
        # fraction of a tile and the row axis can be split across TensorCores.
        n_pad = max(self.LANE, _round_up(N, 8))
        mask = self._roi_pool_mask(rois, B, H, W, n_pad)     # f32 (S*S, n_pad, BHW)
        featf = feat_nhwc.reshape(B * H * W, C)              # f32 (BHW, C) — un-expanded
        out = _boxhead_call(mask, featf, p["fc_w"], p["fc_b"],
                            p["head_w"], p["head_b"], self.head_nout_p)
        nc = self.num_classes
        loc_p = out[:N, : 4 * nc].astype(jnp.float32)
        cls_p = out[:N, 4 * nc: 4 * nc + nc + 1].astype(jnp.float32)
        return (loc_p, cls_p)

    # ---------------- forward (matches torch module semantics) ----------------
    def forward(self, x_nchw, image_gts):
        # NCHW -> NHWC: at these sizes XLA fuses the transpose into the im2col
        # patch gather (no standalone HBM pass); at realistic sizes fold it into
        # the conv kernel's index_map (see TODO at top of file).
        x = jnp.transpose(x_nchw, (0, 2, 3, 1))
        rpn_loc_t, rpn_cls_t, ignore = self.match_anchors(image_gts)
        ps, rois, rpn_loc_p, rpn_cls_p = self.region_proposal(x)
        loc_t, cls_t, rois = self.roi_match(rois, image_gts)
        # roi_pool + box_head are fused into a single Pallas kernel (ps has one level).
        preds = self.box_head(ps[0], rois)
        return preds + (loc_t, cls_t, rpn_loc_p, rpn_cls_p,
                        rpn_loc_t, rpn_cls_t, ignore)


# ----------------------------------------------------------------------------
if __name__ == "__main__":
    key = jax.random.PRNGKey(0)
    k_model, k_x, k_c, k_s, k_l = jax.random.split(key, 5)

    B, C, H, W = 2, 16, 8, 8
    G, num_classes = 3, 3

    model = FasterRCNN(k_model, in_channels=C, rpn_channels=16, num_anchor=3,
                       roi_size=2, hidden=32, num_classes=num_classes,
                       feat_h=H, feat_w=W, top_k=8)

    x = jax.random.normal(k_x, (B, C, H, W), jnp.float32)            # NCHW input

    centers = jax.random.uniform(k_c, (B, G, 2), minval=2.0, maxval=6.0)
    sizes = jax.random.uniform(k_s, (B, G, 2), minval=1.5, maxval=4.0)
    labels = jax.random.randint(k_l, (B, G), 1, num_classes + 1).astype(jnp.float32)
    x1y1 = jnp.clip(centers - sizes / 2, 0.0, float(W))
    x2y2 = jnp.clip(centers + sizes / 2, 0.0, float(W))
    image_gts = jnp.concatenate([x1y1, x2y2, labels[..., None]], axis=-1)  # (B,G,5)

    fwd = jax.jit(model.forward)
    outs = fwd(x, image_gts)
    jax.block_until_ready(outs)

    # basic sanity: 9 outputs (loc_p, cls_p, loc_t, cls_t, rpn_loc_p, rpn_cls_p,
    #                          rpn_loc_t, rpn_cls_t, ignore)
    assert len(outs) == 9
    assert outs[0].shape == (B * 8, 4 * num_classes)
    assert outs[1].shape == (B * 8, num_classes + 1)
    assert outs[4].shape == (B, H * W * 3, 4)
    print("KERNEL_OK")
</pallas_src>

<mosaic_0001>
module attributes {stable_mosaic.version = 11 : i64} {
  func.func @_rpn_kernel(%arg0: i32, %arg1: memref<64x144xbf16, #tpu.memory_space<vmem>>, %arg2: memref<144x16xbf16, #tpu.memory_space<vmem>>, %arg3: memref<1x16xf32, #tpu.memory_space<vmem>>, %arg4: memref<16x128xbf16, #tpu.memory_space<vmem>>, %arg5: memref<1x128xf32, #tpu.memory_space<vmem>>, %arg6: memref<64x128xbf16, #tpu.memory_space<vmem>>) attributes {dimension_semantics = [#tpu.dimension_semantics<parallel>], iteration_bounds = array<i64: 2>, scalar_prefetch = 0 : i64, scratch_operands = 0 : i64, tpu.core_type = #tpu.core_type<tc>, window_params = [{transform_indices = @transform_0, window_bounds = array<i64: 64, 144>}, {pipeline_mode = #tpu.pipeline_mode<synchronous>, transform_indices = @transform_1, window_bounds = array<i64: 144, 16>}, {pipeline_mode = #tpu.pipeline_mode<synchronous>, transform_indices = @transform_2, window_bounds = array<i64: 1, 16>}, {pipeline_mode = #tpu.pipeline_mode<synchronous>, transform_indices = @transform_3, window_bounds = array<i64: 16, 128>}, {pipeline_mode = #tpu.pipeline_mode<synchronous>, transform_indices = @transform_4, window_bounds = array<i64: 1, 128>}, {transform_indices = @transform_5, window_bounds = array<i64: 64, 128>}]} {
    %c0 = arith.constant 0 : index
    %c0_0 = arith.constant 0 : index
    %0 = vector.load %arg1[%c0, %c0_0] : memref<64x144xbf16, #tpu.memory_space<vmem>>, vector<64x144xbf16>
    %c0_1 = arith.constant 0 : index
    %c0_2 = arith.constant 0 : index
    %1 = vector.load %arg2[%c0_1, %c0_2] : memref<144x16xbf16, #tpu.memory_space<vmem>>, vector<144x16xbf16>
    %cst = arith.constant dense<0.000000e+00> : vector<64x16xf32>
    %2 = tpu.matmul %0, %1, %cst {dimension_numbers = #tpu.dot_dimension_numbers<[1], [0], [0], [1], [0, 0, 1, 1], [], []>} : vector<64x144xbf16>, vector<144x16xbf16>, vector<64x16xf32> -> vector<64x16xf32>
    %c0_3 = arith.constant 0 : index
    %c0_4 = arith.constant 0 : index
    %3 = vector.load %arg3[%c0_3, %c0_4] : memref<1x16xf32, #tpu.memory_space<vmem>>, vector<1x16xf32>
    %4 = vector.broadcast %3 : vector<1x16xf32> to vector<64x16xf32>
    %5 = arith.addf %2, %4 : vector<64x16xf32>
    %cst_5 = arith.constant 0.000000e+00 : f32
    %6 = vector.broadcast %cst_5 : f32 to vector<64x16xf32>
    %7 = arith.maximumf %5, %6 : vector<64x16xf32>
    %8 = arith.truncf %7 : vector<64x16xf32> to vector<64x16xbf16>
    %c0_6 = arith.constant 0 : index
    %c0_7 = arith.constant 0 : index
    %9 = vector.load %arg4[%c0_6, %c0_7] : memref<16x128xbf16, #tpu.memory_space<vmem>>, vector<16x128xbf16>
    %cst_8 = arith.constant dense<0.000000e+00> : vector<64x128xf32>
    %10 = tpu.matmul %8, %9, %cst_8 {dimension_numbers = #tpu.dot_dimension_numbers<[1], [0], [0], [1], [0, 0, 1, 1], [], []>} : vector<64x16xbf16>, vector<16x128xbf16>, vector<64x128xf32> -> vector<64x128xf32>
    %c0_9 = arith.constant 0 : index
    %c0_10 = arith.constant 0 : index
    %11 = vector.load %arg5[%c0_9, %c0_10] : memref<1x128xf32, #tpu.memory_space<vmem>>, vector<1x128xf32>
    %12 = vector.broadcast %11 : vector<1x128xf32> to vector<64x128xf32>
    %13 = arith.addf %10, %12 : vector<64x128xf32>
    %14 = arith.truncf %13 : vector<64x128xf32> to vector<64x128xbf16>
    %c0_11 = arith.constant 0 : index
    %c0_12 = arith.constant 0 : index
    %15 = vector.load %arg6[%c0_11, %c0_12] : memref<64x128xbf16, #tpu.memory_space<vmem>>, vector<64x128xbf16>
    tpu.vector_store %arg6[%c0_11, %c0_12], %14 {strides = array<i32>} : memref<64x128xbf16, #tpu.memory_space<vmem>>, vector<64x128xbf16>,
    return
  }
  func.func @transform_0(%arg0: i32) -> (i32, i32) {
    %c0_i32 = arith.constant 0 : i32
    %c0_i32_0 = arith.constant 0 : i32
    return %arg0, %c0_i32 : i32, i32
  }
  func.func @transform_1(%arg0: i32) -> (i32, i32) {
    %c0_i32 = arith.constant 0 : i32
    %c0_i32_0 = arith.constant 0 : i32
    %c0_i32_1 = arith.constant 0 : i32
    return %c0_i32, %c0_i32_0 : i32, i32
  }
  func.func @transform_2(%arg0: i32) -> (i32, i32) {
    %c0_i32 = arith.constant 0 : i32
    %c0_i32_0 = arith.constant 0 : i32
    %c0_i32_1 = arith.constant 0 : i32
    return %c0_i32, %c0_i32_0 : i32, i32
  }
  func.func @transform_3(%arg0: i32) -> (i32, i32) {
    %c0_i32 = arith.constant 0 : i32
    %c0_i32_0 = arith.constant 0 : i32
    %c0_i32_1 = arith.constant 0 : i32
    return %c0_i32, %c0_i32_0 : i32, i32
  }
  func.func @transform_4(%arg0: i32) -> (i32, i32) {
    %c0_i32 = arith.constant 0 : i32
    %c0_i32_0 = arith.constant 0 : i32
    %c0_i32_1 = arith.constant 0 : i32
    return %c0_i32, %c0_i32_0 : i32, i32
  }
  func.func @transform_5(%arg0: i32) -> (i32, i32) {
    %c0_i32 = arith.constant 0 : i32
    %c0_i32_0 = arith.constant 0 : i32
    return %arg0, %c0_i32 : i32, i32
  }
}

module attributes {stable_mosaic.version = 11 : i64} {
  func.func @_boxhead_kernel(%arg0: i32, %arg1: memref<4x64x128xf32, #tpu.memory_space<vmem>>, %arg2: memref<128x16xf32, #tpu.memory_space<vmem>>, %arg3: memref<64x32xbf16, #tpu.memory_space<vmem>>, %arg4: memref<1x32xf32, #tpu.memory_space<vmem>>, %arg5: memref<32x128xbf16, #tpu.memory_space<vmem>>, %arg6: memref<1x128xf32, #tpu.memory_space<vmem>>, %arg7: memref<64x128xbf16, #tpu.memory_space<vmem>>) attributes {dimension_semantics = [#tpu.dimension_semantics<parallel>], iteration_bounds = array<i64: 2>, scalar_prefetch = 0 : i64, scratch_operands = 0 : i64, tpu.core_type = #tpu.core_type<tc>, window_params = [{transform_indices = @transform_0, window_bounds = array<i64: 4, 64, 128>}, {pipeline_mode = #tpu.pipeline_mode<synchronous>, transform_indices = @transform_1, window_bounds = array<i64: 128, 16>}, {pipeline_mode = #tpu.pipeline_mode<synchronous>, transform_indices = @transform_2, window_bounds = array<i64: 64, 32>}, {pipeline_mode = #tpu.pipeline_mode<synchronous>, transform_indices = @transform_3, window_bounds = array<i64: 1, 32>}, {pipeline_mode = #tpu.pipeline_mode<synchronous>, transform_indices = @transform_4, window_bounds = array<i64: 32, 128>}, {pipeline_mode = #tpu.pipeline_mode<synchronous>, transform_indices = @transform_5, window_bounds = array<i64: 1, 128>}, {transform_indices = @transform_6, window_bounds = array<i64: 64, 128>}]} {
    %c0 = arith.constant 0 : index
    %c0_0 = arith.constant 0 : index
    %0 = vector.load %arg2[%c0, %c0_0] : memref<128x16xf32, #tpu.memory_space<vmem>>, vector<128x16xf32>
    %c0_1 = arith.constant 0 : index
    %c0_2 = arith.constant 0 : index
    %1 = vector.load %arg3[%c0_1, %c0_2] : memref<64x32xbf16, #tpu.memory_space<vmem>>, vector<64x32xbf16>
    %cst = arith.constant 0.000000e+00 : f32
    %2 = vector.broadcast %cst : f32 to vector<64x32xf32>
    %c0_3 = arith.constant 0 : index
    %c0_4 = arith.constant 0 : index
    %c0_5 = arith.constant 0 : index
    %3 = vector.load %arg1[%c0_3, %c0_4, %c0_5] : memref<4x64x128xf32, #tpu.memory_space<vmem>>, vector<1x64x128xf32>
    %4 = vector.shape_cast %3 : vector<1x64x128xf32> to vector<64x128xf32>
    %cst_6 = arith.constant dense<0.000000e+00> : vector<64x16xf32>
    %5 = tpu.matmul %4, %0, %cst_6 {dimension_numbers = #tpu.dot_dimension_numbers<[1], [0], [0], [1], [0, 0, 1, 1], [], []>} : vector<64x128xf32>, vector<128x16xf32>, vector<64x16xf32> -> vector<64x16xf32>
    %6 = arith.truncf %5 : vector<64x16xf32> to vector<64x16xbf16>
    %7 = vector.extract_strided_slice %1 {offsets = [0, 0], sizes = [16, 32], strides = [1, 1]} : vector<64x32xbf16> to vector<16x32xbf16>
    %cst_7 = arith.constant dense<0.000000e+00> : vector<64x32xf32>
    %8 = tpu.matmul %6, %7, %cst_7 {dimension_numbers = #tpu.dot_dimension_numbers<[1], [0], [0], [1], [0, 0, 1, 1], [], []>} : vector<64x16xbf16>, vector<16x32xbf16>, vector<64x32xf32> -> vector<64x32xf32>
    %9 = arith.addf %2, %8 : vector<64x32xf32>
    %c1 = arith.constant 1 : index
    %c0_8 = arith.constant 0 : index
    %c0_9 = arith.constant 0 : index
    %10 = vector.load %arg1[%c1, %c0_8, %c0_9] : memref<4x64x128xf32, #tpu.memory_space<vmem>>, vector<1x64x128xf32>
    %11 = vector.shape_cast %10 : vector<1x64x128xf32> to vector<64x128xf32>
    %cst_10 = arith.constant dense<0.000000e+00> : vector<64x16xf32>
    %12 = tpu.matmul %11, %0, %cst_10 {dimension_numbers = #tpu.dot_dimension_numbers<[1], [0], [0], [1], [0, 0, 1, 1], [], []>} : vector<64x128xf32>, vector<128x16xf32>, vector<64x16xf32> -> vector<64x16xf32>
    %13 = arith.truncf %12 : vector<64x16xf32> to vector<64x16xbf16>
    %14 = vector.extract_strided_slice %1 {offsets = [16, 0], sizes = [16, 32], strides = [1, 1]} : vector<64x32xbf16> to vector<16x32xbf16>
    %cst_11 = arith.constant dense<0.000000e+00> : vector<64x32xf32>
    %15 = tpu.matmul %13, %14, %cst_11 {dimension_numbers = #tpu.dot_dimension_numbers<[1], [0], [0], [1], [0, 0, 1, 1], [], []>} : vector<64x16xbf16>, vector<16x32xbf16>, vector<64x32xf32> -> vector<64x32xf32>
    %16 = arith.addf %9, %15 : vector<64x32xf32>
    %c2 = arith.constant 2 : index
    %c0_12 = arith.constant 0 : index
    %c0_13 = arith.constant 0 : index
    %17 = vector.load %arg1[%c2, %c0_12, %c0_13] : memref<4x64x128xf32, #tpu.memory_space<vmem>>, vector<1x64x128xf32>
    %18 = vector.shape_cast %17 : vector<1x64x128xf32> to vector<64x128xf32>
    %cst_14 = arith.constant dense<0.000000e+00> : vector<64x16xf32>
    %19 = tpu.matmul %18, %0, %cst_14 {dimension_numbers = #tpu.dot_dimension_numbers<[1], [0], [0], [1], [0, 0, 1, 1], [], []>} : vector<64x128xf32>, vector<128x16xf32>, vector<64x16xf32> -> vector<64x16xf32>
    %20 = arith.truncf %19 : vector<64x16xf32> to vector<64x16xbf16>
    %21 = vector.extract_strided_slice %1 {offsets = [32, 0], sizes = [16, 32], strides = [1, 1]} : vector<64x32xbf16> to vector<16x32xbf16>
    %cst_15 = arith.constant dense<0.000000e+00> : vector<64x32xf32>
    %22 = tpu.matmul %20, %21, %cst_15 {dimension_numbers = #tpu.dot_dimension_numbers<[1], [0], [0], [1], [0, 0, 1, 1], [], []>} : vector<64x16xbf16>, vector<16x32xbf16>, vector<64x32xf32> -> vector<64x32xf32>
    %23 = arith.addf %16, %22 : vector<64x32xf32>
    %c3 = arith.constant 3 : index
    %c0_16 = arith.constant 0 : index
    %c0_17 = arith.constant 0 : index
    %24 = vector.load %arg1[%c3, %c0_16, %c0_17] : memref<4x64x128xf32, #tpu.memory_space<vmem>>, vector<1x64x128xf32>
    %25 = vector.shape_cast %24 : vector<1x64x128xf32> to vector<64x128xf32>
    %cst_18 = arith.constant dense<0.000000e+00> : vector<64x16xf32>
    %26 = tpu.matmul %25, %0, %cst_18 {dimension_numbers = #tpu.dot_dimension_numbers<[1], [0], [0], [1], [0, 0, 1, 1], [], []>} : vector<64x128xf32>, vector<128x16xf32>, vector<64x16xf32> -> vector<64x16xf32>
    %27 = arith.truncf %26 : vector<64x16xf32> to vector<64x16xbf16>
    %28 = vector.extract_strided_slice %1 {offsets = [48, 0], sizes = [16, 32], strides = [1, 1]} : vector<64x32xbf16> to vector<16x32xbf16>
    %cst_19 = arith.constant dense<0.000000e+00> : vector<64x32xf32>
    %29 = tpu.matmul %27, %28, %cst_19 {dimension_numbers = #tpu.dot_dimension_numbers<[1], [0], [0], [1], [0, 0, 1, 1], [], []>} : vector<64x16xbf16>, vector<16x32xbf16>, vector<64x32xf32> -> vector<64x32xf32>
    %30 = arith.addf %23, %29 : vector<64x32xf32>
    %c0_20 = arith.constant 0 : index
    %c0_21 = arith.constant 0 : index
    %31 = vector.load %arg4[%c0_20, %c0_21] : memref<1x32xf32, #tpu.memory_space<vmem>>, vector<1x32xf32>
    %32 = vector.broadcast %31 : vector<1x32xf32> to vector<64x32xf32>
    %33 = arith.addf %30, %32 : vector<64x32xf32>
    %cst_22 = arith.constant 0.000000e+00 : f32
    %34 = vector.broadcast %cst_22 : f32 to vector<64x32xf32>
    %35 = arith.maximumf %33, %34 : vector<64x32xf32>
    %36 = arith.truncf %35 : vector<64x32xf32> to vector<64x32xbf16>
    %c0_23 = arith.constant 0 : index
    %c0_24 = arith.constant 0 : index
    %37 = vector.load %arg5[%c0_23, %c0_24] : memref<32x128xbf16, #tpu.memory_space<vmem>>, vector<32x128xbf16>
    %cst_25 = arith.constant dense<0.000000e+00> : vector<64x128xf32>
    %38 = tpu.matmul %36, %37, %cst_25 {dimension_numbers = #tpu.dot_dimension_numbers<[1], [0], [0], [1], [0, 0, 1, 1], [], []>} : vector<64x32xbf16>, vector<32x128xbf16>, vector<64x128xf32> -> vector<64x128xf32>
    %c0_26 = arith.constant 0 : index
    %c0_27 = arith.constant 0 : index
    %39 = vector.load %arg6[%c0_26, %c0_27] : memref<1x128xf32, #tpu.memory_space<vmem>>, vector<1x128xf32>
    %40 = vector.broadcast %39 : vector<1x128xf32> to vector<64x128xf32>
    %41 = arith.addf %38, %40 : vector<64x128xf32>
    %42 = arith.truncf %41 : vector<64x128xf32> to vector<64x128xbf16>
    %c0_28 = arith.constant 0 : index
    %c0_29 = arith.constant 0 : index
    %43 = vector.load %arg7[%c0_28, %c0_29] : memref<64x128xbf16, #tpu.memory_space<vmem>>, vector<64x128xbf16>
    tpu.vector_store %arg7[%c0_28, %c0_29], %42 {strides = array<i32>} : memref<64x128xbf16, #tpu.memory_space<vmem>>, vector<64x128xbf16>,
    return
  }
  func.func @transform_0(%arg0: i32) -> (i32, i32, i32) {
    %c0_i32 = arith.constant 0 : i32
    %c0_i32_0 = arith.constant 0 : i32
    %c0_i32_1 = arith.constant 0 : i32
    return %c0_i32, %arg0, %c0_i32_0 : i32, i32, i32
  }
  func.func @transform_1(%arg0: i32) -> (i32, i32) {
    %c0_i32 = arith.constant 0 : i32
    %c0_i32_0 = arith.constant 0 : i32
    %c0_i32_1 = arith.constant 0 : i32
    return %c0_i32, %c0_i32_0 : i32, i32
  }
  func.func @transform_2(%arg0: i32) -> (i32, i32) {
    %c0_i32 = arith.constant 0 : i32
    %c0_i32_0 = arith.constant 0 : i32
    %c0_i32_1 = arith.constant 0 : i32
    return %c0_i32, %c0_i32_0 : i32, i32
  }
  func.func @transform_3(%arg0: i32) -> (i32, i32) {
    %c0_i32 = arith.constant 0 : i32
    %c0_i32_0 = arith.constant 0 : i32
    %c0_i32_1 = arith.constant 0 : i32
    return %c0_i32, %c0_i32_0 : i32, i32
  }
  func.func @transform_4(%arg0: i32) -> (i32, i32) {
    %c0_i32 = arith.constant 0 : i32
    %c0_i32_0 = arith.constant 0 : i32
    %c0_i32_1 = arith.constant 0 : i32
    return %c0_i32, %c0_i32_0 : i32, i32
  }
  func.func @transform_5(%arg0: i32) -> (i32, i32) {
    %c0_i32 = arith.constant 0 : i32
    %c0_i32_0 = arith.constant 0 : i32
    %c0_i32_1 = arith.constant 0 : i32
    return %c0_i32, %c0_i32_0 : i32, i32
  }
  func.func @transform_6(%arg0: i32) -> (i32, i32) {
    %c0_i32 = arith.constant 0 : i32
    %c0_i32_0 = arith.constant 0 : i32
    return %arg0, %c0_i32 : i32, i32
  }
}

</mosaic_0001>

<bundles_post_ra>
// kernel: forward.2
= control target key start
LH: loop header
LB: loop body
LE: loop exit
PB: predicated region body
PF: predicated region fallthrough
CT: control target
= control target key end

     0   :  { %s816_s18 = smov 0   ;;  %s891_s0 = inlined_call_operand.vmem [shape: bf16[128,144], index: 0, kind: input, shape index: {}]   ;;  %s892_s1 = inlined_call_operand.vmem [shape: bf16[144,16], index: 1, kind: input, shape index: {}]   ;;  %s893_s2 = inlined_call_operand.vmem [shape: f32[1,16], index: 2, kind: input, shape index: {}]   ;;  %s894_s3 = inlined_call_operand.vmem [shape: bf16[16,128], index: 3, kind: input, shape index: {}]   ;;  %s895_s4 = inlined_call_operand.vmem [shape: f32[1,128], index: 4, kind: input, shape index: {}]   ;;  %s896_s5 = inlined_call_operand.vmem [shape: bf16[128,128], index: 5, kind: output, shape index: {}]  }
   0x1 LB: > { %s633_s19 = sadd.s32 4294967295, %s783_s18   ;;  %p637_p0 = scmp.ge.s32.totalorder %s783_s18, 1  ;;  %s783_s18 = sphi %s816_s18, %s15_s18  }
   0x2   : > { %p189_p1 = scmp.lt.s32.totalorder %s783_s18, 3 }
   0x4   : > { %p190_p2 = pnand %p637_p0, %p189_p1 }
   0x5   : > { %v755_v0 = vld [vmem:[%s892_s1] sm:$0xff] (!%p190_p2)   ;;  %v785_v1 = vmov (!%p190_p2), 0   ;;  %s638_s22 = sshll.u32 (!%p190_p2), %s633_s19, 3  ;;  %v756_v2 = vld [vmem:[%s892_s1 + $0x8] sm:$0xff] (!%p190_p2)   ;;  %v757_v3 = vld [vmem:[%s892_s1 + $0x10] sm:$0xff] (!%p190_p2)   ;;  %vm355_vm0 = vcmask (!%p190_p2), 130048  }
   0x6   : > { %193 = sbr.rel (%p190_p2) target bundleno = 499 (0x1f3), region = 40  ;;  %368 = vmatprep.subr.bf16.mxu0 (!%p190_p2), %v785_v1  ;;  %728 = vmatprep.subr.bf16.mxu1 (!%p190_p2), %v785_v1  ;;  %p219_p3 = scmp.lt.s32.totalorder (!%p190_p2), %s638_s22, 15  ;;  %v758_v4 = vld [vmem:[%s892_s1 + $0x18] sm:$0xff] (!%p190_p2)   ;;  %v759_v7 = vld [vmem:[%s892_s1 + $0x20] sm:$0xff] (!%p190_p2)   ;;  %v760_v8 = vld [vmem:[%s892_s1 + $0x28] sm:$0xff] (!%p190_p2)  }
   0x7   : > { %369 = vmatpush1.bf16.msra.mxu0 (!%p190_p2), %v755_v0  ;;  %737 = vmatpush1.bf16.msra.mxu1 (!%p190_p2), %v755_v0  ;;  %v761_v9 = vld [vmem:[%s892_s1 + $0x30] sm:$0xff] (!%p190_p2)   ;;  %v762_v10 = vld [vmem:[%s892_s1 + $0x38] sm:$0xff] (!%p190_p2)   ;;  %v763_v11 = vld [vmem:[%s892_s1 + $0x40] sm:$0xff] (!%p190_p2)  }
   0x8   : > { %370 = vmatprep.subr.bf16.mxu0 (!%p190_p2), %v785_v1  ;;  %729 = vmatprep.subr.bf16.mxu1 (!%p190_p2), %v785_v1  ;;  %v776_v18 = vld [vmem:[%s894_s3] sm:$0xff] (!%p190_p2)  }
   0x9   : > { %v643_v19 = vld [vmem:[%s893_s2] ss:$0 sm:$0xff] (!%p190_p2) }
   0xa   : > { %v665_v57 = vld [vmem:[%s895_s4] ss:$0 sm:$0xff] (!%p190_p2) }
   0xb   : > { %371 = vmatpush1.bf16.msra.mxu0 (!%p190_p2), %v756_v2  ;;  %738 = vmatpush1.bf16.msra.mxu1 (!%p190_p2), %v756_v2 }
   0xc   : > { %372 = vmatprep.subr.bf16.mxu0 (!%p190_p2), %v785_v1  ;;  %730 = vmatprep.subr.bf16.mxu1 (!%p190_p2), %v785_v1 }
   0xd   : > { %s898_s22 = smov (!%p219_p3, %s638_s22), 15 }
   0xe   : > { %s681_s27 = sshll.u32 %s898_s22, 3  ;;  %s642_s26 = sshll.u32 %s898_s22, 2 }
   0xf   : > { %s839_s30 = scalar_lea.vmem %s891_s0, %s681_s27  ;;  %373 = vmatpush1.bf16.msra.mxu0 %v757_v3  ;;  %739 = vmatpush1.bf16.msra.mxu1 %v757_v3  ;;  %s229_s29 = scalar_lea.vmem %s896_s5, %s642_s26 }
  0x10   : > { %v766_v5 = vld [vmem:[%s839_s30 + $0x4] ss:$8 sps:$4 sm:$0xff]   ;;  %374 = vmatprep.subr.bf16.mxu0 %v785_v1  ;;  %731 = vmatprep.subr.bf16.mxu1 %v785_v1  ;;  %v772_v6 = vld [vmem:[%s839_s30 + $0x34] ss:$8 sps:$4 sm:$0xff]   ;;  %v764_v12 = vld [vmem:[%s839_s30] ss:$8 sps:$4 sm:$0xff]  }
  0x11   : > { %661 = vmatprep.mubr.msk.bf16.mxu0 %vm355_vm0, %v766_v5  ;;  %664 = vmatprep.mubr.msk.bf16.mxu1 %vm355_vm0, %v772_v6  ;;  %v770_v13 = vld [vmem:[%s839_s30 + $0x30] ss:$8 sps:$4 sm:$0xff]   ;;  %v767_v14 = vld [vmem:[%s839_s30 + $0x14] ss:$8 sps:$4 sm:$0xff]   ;;  %v773_v16 = vld [vmem:[%s839_s30 + $0x24] ss:$8 sps:$4 sm:$0xff]  }
  0x12   : > { %v769_v15 = vld [vmem:[%s839_s30 + $0x10] ss:$8 sps:$4 sm:$0xff]   ;;  %v775_v17 = vld [vmem:[%s839_s30 + $0x20] ss:$8 sps:$4 sm:$0xff]  }
  0x13   : > { %375 = vmatpush1.bf16.msra.mxu0 %v758_v4  ;;  %740 = vmatpush1.bf16.msra.mxu1 %v758_v4 }
  0x14   : > { %376 = vmatprep.subr.bf16.mxu0 %v785_v1  ;;  %732 = vmatprep.subr.bf16.mxu1 %v785_v1 }
  0x17   : > { %377 = vmatpush1.bf16.msra.mxu0 %v759_v7  ;;  %741 = vmatpush1.bf16.msra.mxu1 %v759_v7 }
  0x18   : > { %378 = vmatprep.subr.bf16.mxu0 %v785_v1  ;;  %733 = vmatprep.subr.bf16.mxu1 %v785_v1 }
  0x1b   : > { %379 = vmatpush1.bf16.msra.mxu0 %v760_v8  ;;  %742 = vmatpush1.bf16.msra.mxu1 %v760_v8 }
  0x1c   : > { %380 = vmatprep.subr.bf16.mxu0 %v785_v1  ;;  %734 = vmatprep.subr.bf16.mxu1 %v785_v1 }
  0x1f   : > { %381 = vmatpush1.bf16.msra.mxu0 %v761_v9  ;;  %743 = vmatpush1.bf16.msra.mxu1 %v761_v9 }
  0x20   : > { %382 = vmatprep.subr.bf16.mxu0 %v785_v1  ;;  %735 = vmatprep.subr.bf16.mxu1 %v785_v1 }
  0x23   : > { %383 = vmatpush1.bf16.msra.mxu0 %v762_v10  ;;  %744 = vmatpush1.bf16.msra.mxu1 %v762_v10 }
  0x24   : > { %384 = vmatprep.subr.bf16.mxu0 %v785_v1  ;;  %736 = vmatprep.subr.bf16.mxu1 %v785_v1 }
  0x27   : > { %385 = vmatpush1.bf16.msra.mxu0 %v763_v11  ;;  %745 = vmatpush1.bf16.msra.mxu1 %v763_v11 }
  0x28   : > { %718 = vmatprep.subr.bf16.mxu1 %v776_v18 }
  0x2a   : > { %401 = vmatmul.mubr.bf16.vlgmr.msra.gmra.mrb[0].mxu0 %v764_v12  ;;  %425 = vmatmul.mubr.bf16.vlgmr.msra.gmra.mrb[0].mxu1 %v770_v13 }
  0x2b   : > { %662 = vmatprep.mubr.msk.bf16.mxu0 %vm355_vm0, %v767_v14  ;;  %719 = vmatpush3.bf16.msra.mxu1 %v776_v18 }
  0x32   : > { %409 = vmatmul.mubr.bf16.gmra.mrb[4].mxu0 %v769_v15 }
  0x33   : > { %663 = vmatprep.mubr.msk.bf16.mxu0 %vm355_vm0, %v773_v16 }
  0x3a   : > { %417 = vmatmul.mubr.bf16.gmra.mrb[8].mxu0 %v775_v17 }
  0xfd   : > { %v402_v20 = vpop.f32.mrb[0].mxu0  ;;  %v426_v21 = vpop.f32.mrb[0].mxu1 }
  0xfe   : > { %v403_v22 = vadd.f32 %v643_v19, %v402_v20  ;;  %v404_v23 = vpop.f32.mrb[1].mxu0  ;;  %v427_v24 = vadd.f32 %v643_v19, %v426_v21  ;;  %v428_v25 = vpop.f32.mrb[1].mxu1 }
  0xff   : > { %v405_v26 = vpop.f32.mrb[2].mxu0  ;;  %v429_v27 = vpop.f32.mrb[2].mxu1 }
 0x100   : > { %v406_v28 = vadd.f32 %v643_v19, %v405_v26  ;;  %v407_v29 = vpop.f32.mrb[3].mxu0  ;;  %v439_v30 = vmax.f32 %v427_v24, 0.0  ;;  %v430_v31 = vadd.f32 %v643_v19, %v429_v27  ;;  %v431_v32 = vpop.f32.mrb[3].mxu1  ;;  %v433_v33 = vmax.f32 %v403_v22, 0.0 }
 0x102   : > { %v434_v34 = vmax.f32 %v406_v28, 0.0  ;;  %v440_v35 = vmax.f32 %v430_v31, 0.0 }
 0x104   : > { %v441_v36 = vpack.c.bf16 %v434_v34, %v433_v33  ;;  %v444_v37 = vpack.c.bf16 %v440_v35, %v439_v30 }
 0x105   : > { %v410_v38 = vpop.f32.mrb[4].mxu0 }
 0x106   : > { %v411_v39 = vadd.f32 %v643_v19, %v410_v38  ;;  %v412_v40 = vpop.f32.mrb[5].mxu0  ;;  %720 = vmatprep.mubr.msk.bf16.mxu1 %vm355_vm0, %v441_v36 }
 0x107   : > { %v413_v41 = vpop.f32.mrb[6].mxu0 }
 0x108   : > { %v414_v42 = vadd.f32 %v643_v19, %v413_v41  ;;  %v415_v43 = vpop.f32.mrb[7].mxu0  ;;  %v435_v44 = vmax.f32 %v411_v39, 0.0 }
 0x10a   : > { %v436_v45 = vmax.f32 %v414_v42, 0.0 }
 0x10c   : > { %v442_v46 = vpack.c.bf16 %v436_v45, %v435_v44 }
 0x10d   : > { %v418_v47 = vpop.f32.mrb[8].mxu0 }
 0x10e   : > { %v419_v48 = vadd.f32 %v643_v19, %v418_v47  ;;  %v420_v49 = vpop.f32.mrb[9].mxu0  ;;  %721 = vmatmul.mubr.msk.bf16.vlgmr.msra.gmra.mrb[4].mxu1 %vm355_vm0, %v442_v46 }
 0x10f   : > { %v421_v50 = vpop.f32.mrb[10].mxu0 }
 0x110   : > { %v422_v51 = vadd.f32 %v643_v19, %v421_v50  ;;  %v423_v52 = vpop.f32.mrb[11].mxu0  ;;  %v437_v53 = vmax.f32 %v419_v48, 0.0 }
 0x112   : > { %v438_v54 = vmax.f32 %v422_v51, 0.0 }
 0x114   : > { %v443_v55 = vpack.c.bf16 %v438_v54, %v437_v53 }
 0x116   : > { %724 = vmatprep.mubr.msk.bf16.mxu1 %vm355_vm0, %v443_v55 }
 0x117   : > { %725 = vmatmul.mubr.msk.bf16.gmra.mrb[8].mxu1 %vm355_vm0, %v444_v37 }
 0x1e1   : > { %v722_v56 = vpop.f32.mrb[4].mxu1 }
 0x1e2   : > { %v506_v58 = vpop.f32.mrb[5].mxu1  ;;  %v515_v60 = vadd.f32 %v722_v56, %v665_v57 }
 0x1e3   : > { %v723_v59 = vpop.f32.mrb[6].mxu1  ;;  %v507_v63 = vadd.f32 %v665_v57, %v506_v58 }
 0x1e4   : > { %v518_v61 = vadd.f32 %v723_v59, %v665_v57  ;;  %v509_v62 = vpop.f32.mrb[7].mxu1 }
 0x1e5   : > { %v510_v0 = vadd.f32 %v665_v57, %v509_v62 }
 0x1e6   : > { %v698_v1 = vpack.c.bf16 %v518_v61, %v515_v60 }
 0x1e7   : > { %v693_v2 = vpack.c.bf16 %v510_v0, %v507_v63 }
 0x1e8   : > { %710 = vst [vmem:[%s229_s29 + $0x8] sm:$0xff] %v698_v1  }
 0x1e9   : > { %694 = vst [vmem:[%s229_s29] sm:$0xff] %v693_v2  }
 0x1ea   : > { %v726_v3 = vpop.f32.mrb[8].mxu1 }
 0x1eb   : > { %v522_v4 = vpop.f32.mrb[9].mxu1  ;;  %v531_v6 = vadd.f32 %v726_v3, %v665_v57 }
 0x1ec   : > { %v727_v5 = vpop.f32.mrb[10].mxu1  ;;  %v523_v9 = vadd.f32 %v665_v57, %v522_v4 }
 0x1ed   : > { %v534_v7 = vadd.f32 %v727_v5, %v665_v57  ;;  %v525_v8 = vpop.f32.mrb[11].mxu1 }
 0x1ee   : > { %v526_v10 = vadd.f32 %v665_v57, %v525_v8 }
 0x1ef   : > { %v708_v11 = vpack.c.bf16 %v534_v7, %v531_v6 }
 0x1f0   : > { %v703_v12 = vpack.c.bf16 %v526_v10, %v523_v9 }
 0x1f1   : > { %712 = vst [vmem:[%s229_s29 + $0x18] sm:$0xff] %v708_v11  }
 0x1f2   : > { %711 = vst [vmem:[%s229_s29 + $0x10] sm:$0xff] %v703_v12  }
 0x1f3 PF: > { %s15_s18 = sadd.s32 1, %s783_s18  }
 0x1f4   : > { %p12_p4 = scmp.ge.s32.totalorder %s15_s18, 4  }
 0x1f6   :  { %14 = sbr.rel (!%p12_p4) target bundleno = 1 (0x1), region = 70 }

// kernel: eq.22
= control target key start
LH: loop header
LB: loop body
LE: loop exit
PB: predicated region body
PF: predicated region fallthrough
CT: control target
= control target key end

     0   :  { %vm7_vm0 = vcmask 23552   ;;  %vm13_vm1 = vcmask 48152   ;;  %s39_s0 = inlined_call_operand.vmem [shape: s32[2,3], index: 0, kind: input, shape index: {}]   ;;  %s40_s1 = inlined_call_operand.vmem [shape: s32[6], index: 1, kind: output, shape index: {}]  }
   0x1   :  { %v4_v0 = vld [vmem:[%s39_s0] sm:$0x3]  ;;  %s22_s0 = smov 3  }
   0x2   :  { %5 = vst [vmem:[#allocation1] sm:$0x3] %v4_v0 }
   0x9   :  { %v10_v1 = vld [vmem:[#allocation1 + $0x1] sm:$0x1]   ;;  %v6_v2 = vld [vmem:[#allocation1] sm:$0x1]  }
   0xa   :  { %11 = vrot.lane.b32.xlu0 %v10_v1, %s22_s0  ;;  %8 = vst.msk [vmem:[#allocation0] sm:$0x1] %vm7_vm0, %v6_v2  }
  0x7c   :  { %v12_v3 = vpop.permute.xlu0 %11  }
  0x7d   :  { %14 = vst.msk [vmem:[#allocation0] sm:$0x1] %vm13_vm1, %v12_v3  }
  0x84   :  { %v18_v4 = vld [vmem:[#allocation0] sm:$0x1] }
  0x85   :  { %20 = vst [vmem:[%s40_s1] sm:$0x1] %v18_v4 }

// kernel: forward.3
= control target key start
LH: loop header
LB: loop body
LE: loop exit
PB: predicated region body
PF: predicated region fallthrough
CT: control target
= control target key end

     0   :  { %s2186_s21 = smov 0   ;;  %s2188_s22 = smov 0   ;;  %s2512_s0 = inlined_call_operand.vmem [shape: f32[4,128,128], index: 0, kind: input, shape index: {}]   ;;  %s2513_s1 = inlined_call_operand.vmem [shape: f32[128,16], index: 1, kind: input, shape index: {}]   ;;  %s2514_s2 = inlined_call_operand.vmem [shape: bf16[64,32], index: 2, kind: input, shape index: {}]   ;;  %s2515_s3 = inlined_call_operand.vmem [shape: f32[1,32], index: 3, kind: input, shape index: {}]   ;;  %s2516_s4 = inlined_call_operand.vmem [shape: bf16[32,128], index: 4, kind: input, shape index: {}]   ;;  %s2517_s5 = inlined_call_operand.vmem [shape: f32[1,128], index: 5, kind: input, shape index: {}]   ;;  %s2518_s6 = inlined_call_operand.vmem [shape: bf16[128,128], index: 6, kind: output, shape index: {}]  }
   0x1   :  { %s2190_s23 = smov 0  }
   0x2 LB: > { %s1488_s24 = sadd.s32 4294967295, %s2149_s23   ;;  %s2203_s25 = sadd.s32 1, %s2149_s23   ;;  %s2149_s23 = sphi %s2190_s23, %s2521_s23   ;;  %s2145_s22 = sphi %s2188_s22, %s2520_s22   ;;  %s2141_s21 = sphi %s2186_s21, %s2519_s21  }
   0x3   : > { %s20_s26 = ssub.s32 %s2149_s23, %s2203_s25  ;;  %s23_s27 = sadd.s32 1, %s2145_s22 }
   0x4   : > { %p21_p0 = scmp.eq.s32.totalorder %s20_s26, 0  ;;  %p30_p1 = scmp.ne.s32.totalorder %s2145_s22, %s2141_s21 }
   0x5   : > { %p31_p2 = scmp.eq.s32.totalorder %s2149_s23, 0  ;;  %p1491_p4 = scmp.ge.s32.totalorder %s2149_s23, 2 }
   0x6   : > { %s2212_s28 = scalar_select %p21_p0, %s2145_s22, %s23_s27  }
   0x7   : > { %p32_p3 = por %p31_p2, %p30_p1  ;;  %202 = sbr.rel (%p1491_p4) target bundleno = 34 (0x22), region = 36 }
   0xe   : > { %205 = sbr.rel (!%p32_p3) target bundleno = 34 (0x22), region = 40  ;;  %s207_s29 = sand.u32 (%p32_p3), 1, %s2145_s22  }
   0xf   : > { %s1561_s30 = sshll.u32 (%p32_p3), %s2149_s23, 6  ;;  %s1492_s7 = sshll.u32 (%p32_p3), %s207_s29, 8 }
  0x10   : > { %s2220_s10 = scalar_lea.vmem (%p32_p3), %s2512_s0, %s1561_s30  ;;  %s2225_s11 = scalar_lea.vmem (%p32_p3), [#allocation2], %s1492_s7 }
  0x11   : > { %v302_v0 = vld [vmem:[%s2220_s10] sm:$0xff] (%p32_p3)  ;;  %v304_v1 = vld [vmem:[%s2220_s10 + $0x8] sm:$0xff] (%p32_p3)  ;;  %v306_v2 = vld [vmem:[%s2220_s10 + $0x10] sm:$0xff] (%p32_p3) }
  0x12   : > { %303 = vst [vmem:[%s2225_s11] sm:$0xff] (%p32_p3), %v302_v0  ;;  %305 = vst [vmem:[%s2225_s11 + $0x8] sm:$0xff] (%p32_p3), %v304_v1  ;;  %v308_v3 = vld [vmem:[%s2220_s10 + $0x18] sm:$0xff] (%p32_p3)  ;;  %v310_v4 = vld [vmem:[%s2220_s10 + $0x20] sm:$0xff] (%p32_p3) }
  0x13   : > { %307 = vst [vmem:[%s2225_s11 + $0x10] sm:$0xff] (%p32_p3), %v306_v2  ;;  %v312_v5 = vld [vmem:[%s2220_s10 + $0x28] sm:$0xff] (%p32_p3)  ;;  %309 = vst [vmem:[%s2225_s11 + $0x18] sm:$0xff] (%p32_p3), %v308_v3  ;;  %v314_v6 = vld [vmem:[%s2220_s10 + $0x30] sm:$0xff] (%p32_p3) }
  0x14   : > { %311 = vst [vmem:[%s2225_s11 + $0x20] sm:$0xff] (%p32_p3), %v310_v4  ;;  %313 = vst [vmem:[%s2225_s11 + $0x28] sm:$0xff] (%p32_p3), %v312_v5  ;;  %v316_v7 = vld [vmem:[%s2220_s10 + $0x38] sm:$0xff] (%p32_p3)  ;;  %v318_v8 = vld [vmem:[%s2220_s10 + $0x80] sm:$0xff] (%p32_p3) }
  0x15   : > { %315 = vst [vmem:[%s2225_s11 + $0x30] sm:$0xff] %v314_v6  ;;  %317 = vst [vmem:[%s2225_s11 + $0x38] sm:$0xff] %v316_v7  ;;  %v320_v9 = vld [vmem:[%s2220_s10 + $0x88] sm:$0xff]  ;;  %v322_v10 = vld [vmem:[%s2220_s10 + $0x90] sm:$0xff] }
  0x16   : > { %319 = vst [vmem:[%s2225_s11 + $0x40] sm:$0xff] %v318_v8  ;;  %v324_v11 = vld [vmem:[%s2220_s10 + $0x98] sm:$0xff]  ;;  %321 = vst [vmem:[%s2225_s11 + $0x48] sm:$0xff] %v320_v9  ;;  %v326_v12 = vld [vmem:[%s2220_s10 + $0xa0] sm:$0xff] }
  0x17   : > { %323 = vst [vmem:[%s2225_s11 + $0x50] sm:$0xff] %v322_v10  ;;  %325 = vst [vmem:[%s2225_s11 + $0x58] sm:$0xff] %v324_v11  ;;  %v328_v13 = vld [vmem:[%s2220_s10 + $0xa8] sm:$0xff]  ;;  %v330_v14 = vld [vmem:[%s2220_s10 + $0xb0] sm:$0xff] }
  0x18   : > { %327 = vst [vmem:[%s2225_s11 + $0x60] sm:$0xff] %v326_v12  ;;  %329 = vst [vmem:[%s2225_s11 + $0x68] sm:$0xff] %v328_v13  ;;  %v332_v15 = vld [vmem:[%s2220_s10 + $0xb8] sm:$0xff]  ;;  %v334_v16 = vld [vmem:[%s2220_s10 + $0x100] sm:$0xff] }
  0x19   : > { %331 = vst [vmem:[%s2225_s11 + $0x70] sm:$0xff] %v330_v14  ;;  %v336_v17 = vld [vmem:[%s2220_s10 + $0x108] sm:$0xff]  ;;  %333 = vst [vmem:[%s2225_s11 + $0x78] sm:$0xff] %v332_v15  ;;  %v338_v18 = vld [vmem:[%s2220_s10 + $0x110] sm:$0xff] }
  0x1a   : > { %335 = vst [vmem:[%s2225_s11 + $0x80] sm:$0xff] %v334_v16  ;;  %337 = vst [vmem:[%s2225_s11 + $0x88] sm:$0xff] %v336_v17  ;;  %v340_v19 = vld [vmem:[%s2220_s10 + $0x118] sm:$0xff]  ;;  %v342_v20 = vld [vmem:[%s2220_s10 + $0x120] sm:$0xff] }
  0x1b   : > { %339 = vst [vmem:[%s2225_s11 + $0x90] sm:$0xff] %v338_v18  ;;  %341 = vst [vmem:[%s2225_s11 + $0x98] sm:$0xff] %v340_v19  ;;  %v344_v21 = vld [vmem:[%s2220_s10 + $0x128] sm:$0xff]  ;;  %v346_v22 = vld [vmem:[%s2220_s10 + $0x130] sm:$0xff] }
  0x1c   : > { %343 = vst [vmem:[%s2225_s11 + $0xa0] sm:$0xff] %v342_v20  ;;  %v348_v23 = vld [vmem:[%s2220_s10 + $0x138] sm:$0xff]  ;;  %345 = vst [vmem:[%s2225_s11 + $0xa8] sm:$0xff] %v344_v21  ;;  %v350_v24 = vld [vmem:[%s2220_s10 + $0x180] sm:$0xff] }
  0x1d   : > { %347 = vst [vmem:[%s2225_s11 + $0xb0] sm:$0xff] %v346_v22  ;;  %349 = vst [vmem:[%s2225_s11 + $0xb8] sm:$0xff] %v348_v23  ;;  %v352_v25 = vld [vmem:[%s2220_s10 + $0x188] sm:$0xff]  ;;  %v354_v26 = vld [vmem:[%s2220_s10 + $0x190] sm:$0xff] }
  0x1e   : > { %351 = vst [vmem:[%s2225_s11 + $0xc0] sm:$0xff] %v350_v24  ;;  %353 = vst [vmem:[%s2225_s11 + $0xc8] sm:$0xff] %v352_v25  ;;  %v356_v27 = vld [vmem:[%s2220_s10 + $0x198] sm:$0xff]  ;;  %v358_v28 = vld [vmem:[%s2220_s10 + $0x1a0] sm:$0xff] }
  0x1f   : > { %355 = vst [vmem:[%s2225_s11 + $0xd0] sm:$0xff] %v354_v26  ;;  %v360_v29 = vld [vmem:[%s2220_s10 + $0x1a8] sm:$0xff]  ;;  %357 = vst [vmem:[%s2225_s11 + $0xd8] sm:$0xff] %v356_v27  ;;  %v362_v30 = vld [vmem:[%s2220_s10 + $0x1b0] sm:$0xff] }
  0x20   : > { %359 = vst [vmem:[%s2225_s11 + $0xe0] sm:$0xff] %v358_v28  ;;  %361 = vst [vmem:[%s2225_s11 + $0xe8] sm:$0xff] %v360_v29  ;;  %v364_v31 = vld [vmem:[%s2220_s10 + $0x1b8] sm:$0xff] }
  0x21   : > { %363 = vst [vmem:[%s2225_s11 + $0xf0] sm:$0xff] %v362_v30  ;;  %365 = vst [vmem:[%s2225_s11 + $0xf8] sm:$0xff] %v364_v31 }
  0x22 PF: > { %p1495_p5 = scmp.ge.s32.totalorder %s2149_s23, 1  ;;  %p370_p6 = scmp.lt.s32.totalorder %s2149_s23, 3 }
  0x24   : > { %p371_p7 = pnand %p1495_p5, %p370_p6 }
  0x25   : > { %v414_v32 = vld [vmem:[%s2513_s1] sm:$0xff] (!%p371_p7)  ;;  %v415_v33 = vld [vmem:[%s2513_s1 + $0x8] sm:$0xff] (!%p371_p7)  ;;  %v416_v34 = vld [vmem:[%s2513_s1 + $0x10] sm:$0xff] (!%p371_p7)  ;;  %s377_s18 = sand.u32 (!%p371_p7), 1, %s2141_s21   ;;  %vm679_vm0 = vcmask (!%p371_p7), 130048   ;;  %vm1308_vm1 = vcmask (!%p371_p7), 261120  }
  0x26   : > { %374 = sbr.rel (%p371_p7) target bundleno = 807 (0x327), region = 78  ;;  %v2300_v35 = vpack.c.bf16 (!%p371_p7), %v415_v33, %v414_v32  ;;  %v417_v36 = vld [vmem:[%s2513_s1 + $0x18] sm:$0xff] (!%p371_p7)  ;;  %s1496_s26 = sshll.u32 (!%p371_p7), %s377_s18, 8  ;;  %v418_v38 = vld [vmem:[%s2513_s1 + $0x20] sm:$0xff] (!%p371_p7)  ;;  %v419_v39 = vld [vmem:[%s2513_s1 + $0x28] sm:$0xff] (!%p371_p7) }
  0x27   : > { %v2305_v37 = vpack.c.bf16 (!%p371_p7), %v417_v36, %v416_v34  ;;  %v2318_v40 = vpack.c.bf16 (!%p371_p7), %v419_v39, %v418_v38  ;;  %s2321_s21 = scalar_lea.vmem (!%p371_p7), [#allocation2], %s1496_s26  ;;  %v420_v42 = vld [vmem:[%s2513_s1 + $0x30] sm:$0xff] (!%p371_p7)  ;;  %v421_v43 = vld [vmem:[%s2513_s1 + $0x38] sm:$0xff] (!%p371_p7)  ;;  %v422_v46 = vld [vmem:[%s2513_s1 + $0x40] sm:$0xff] (!%p371_p7)  ;;  %s1497_s29 = sshll.u32 (!%p371_p7), %s1488_s24, 3 }
  0x28   : > { %1976 = vmatprep.subr.bf16.mxu1 (!%p371_p7), %v2300_v35  ;;  %1944 = vmatprep.subr.bf16.mxu0 (!%p371_p7), %v2300_v35  ;;  %v1499_v41 = vld [vmem:[%s2321_s21 + $0x40] sm:$0xff] (!%p371_p7)  ;;  %v2334_v45 = vpack.c.bf16 (!%p371_p7), %v421_v43, %v420_v42  ;;  %v423_v47 = vld [vmem:[%s2513_s1 + $0x48] sm:$0xff] (!%p371_p7)  ;;  %v424_v49 = vld [vmem:[%s2513_s1 + $0x50] sm:$0xff] (!%p371_p7)  ;;  %p408_p8 = scmp.lt.s32.totalorder (!%p371_p7), %s1497_s29, 15 }
  0x29   : > { %1978 = vmatpush3.bf16.msra.mxu1 (!%p371_p7), %v2300_v35  ;;  %1946 = vmatpush3.bf16.msra.mxu0 (!%p371_p7), %v2300_v35  ;;  %v438_v44 = vld [vmem:[%s2321_s21] sm:$0xff] (!%p371_p7)  ;;  %v2346_v48 = vpack.c.bf16 (!%p371_p7), %v423_v47, %v422_v46  ;;  %v425_v50 = vld [vmem:[%s2513_s1 + $0x58] sm:$0xff] (!%p371_p7)  ;;  %v427_v52 = vld [vmem:[%s2513_s1 + $0x68] sm:$0xff] (!%p371_p7) }
  0x2a   : > { %1980 = vmatprep.subr.bf16.mxu1 (!%p371_p7), %v2305_v37  ;;  %1948 = vmatprep.subr.bf16.mxu0 (!%p371_p7), %v2305_v37  ;;  %v426_v51 = vld [vmem:[%s2513_s1 + $0x60] sm:$0xff] (!%p371_p7)  ;;  %v2364_v53 = vpack.c.bf16 (!%p371_p7), %v425_v50, %v424_v49  ;;  %v428_v55 = vld [vmem:[%s2513_s1 + $0x70] sm:$0xff] (!%p371_p7)  ;;  %v429_v56 = vld [vmem:[%s2513_s1 + $0x78] sm:$0xff] (!%p371_p7) }
  0x2b   : > { %1791 = vmatprep.mubr.f32.mxu1 (!%p371_p7), %v1499_v41  ;;  %1747 = vmatprep.mubr.f32.mxu0 (!%p371_p7), %v438_v44  ;;  %v2370_v54 = vpack.c.bf16 (!%p371_p7), %v427_v52, %v426_v51  ;;  %v2382_v57 = vpack.c.bf16 (!%p371_p7), %v429_v56, %v428_v55  ;;  %v1500_v58 = vld [vmem:[%s2321_s21 + $0x48] sm:$0xff] (!%p371_p7)  ;;  %v1501_v60 = vld [vmem:[%s2321_s21 + $0x50] sm:$0xff] (!%p371_p7)  ;;  %v1502_v62 = vld [vmem:[%s2321_s21 + $0x58] sm:$0xff] (!%p371_p7) }
  0x2c   : > { %v439_v59 = vld [vmem:[%s2321_s21 + $0x8] sm:$0xff] (!%p371_p7)  ;;  %v440_v61 = vld [vmem:[%s2321_s21 + $0x10] sm:$0xff] (!%p371_p7)  ;;  %v441_v63 = vld [vmem:[%s2321_s21 + $0x18] sm:$0xff] (!%p371_p7) }
  0x2d   : > { %1982 = vmatpush3.bf16.msra.mxu1 %v2305_v37  ;;  %1950 = vmatpush3.bf16.msra.mxu0 %v2305_v37  ;;  %v1503_v0 = vld [vmem:[%s2321_s21 + $0x60] sm:$0xff]  ;;  %v1504_v2 = vld [vmem:[%s2321_s21 + $0x68] sm:$0xff]  ;;  %v1505_v4 = vld [vmem:[%s2321_s21 + $0x70] sm:$0xff]  ;;  %s2523_s29 = smov (!%p408_p8, %s1497_s29), 15 }
  0x2e   : > { %1984 = vmatprep.subr.bf16.mxu1 %v2318_v40  ;;  %1952 = vmatprep.subr.bf16.mxu0 %v2318_v40  ;;  %v442_v1 = vld [vmem:[%s2321_s21 + $0x20] sm:$0xff]  ;;  %v443_v3 = vld [vmem:[%s2321_s21 + $0x28] sm:$0xff]  ;;  %v444_v5 = vld [vmem:[%s2321_s21 + $0x30] sm:$0xff]  ;;  %s1498_s8 = sshll.u32 %s2523_s29, 2 }
  0x2f   : > { %v1506_v6 = vld [vmem:[%s2321_s21 + $0x78] sm:$0xff]  ;;  %v1517_v8 = vld [vmem:[%s2321_s21 + $0x80] sm:$0xff]  ;;  %v1518_v9 = vld [vmem:[%s2321_s21 + $0x88] sm:$0xff]  ;;  %s411_s11 = scalar_lea.vmem %s2518_s6, %s1498_s8 }
  0x30   : > { %v445_v7 = vld [vmem:[%s2321_s21 + $0x38] sm:$0xff]  ;;  %v1519_v10 = vld [vmem:[%s2321_s21 + $0x90] sm:$0xff]  ;;  %v1521_v12 = vld [vmem:[%s2321_s21 + $0xa0] sm:$0xff] }
  0x31   : > { %1986 = vmatpush3.bf16.msra.mxu1 %v2318_v40  ;;  %1954 = vmatpush3.bf16.msra.mxu0 %v2318_v40  ;;  %v1520_v11 = vld [vmem:[%s2321_s21 + $0x98] sm:$0xff]  ;;  %v1522_v13 = vld [vmem:[%s2321_s21 + $0xa8] sm:$0xff]  ;;  %v1523_v14 = vld [vmem:[%s2321_s21 + $0xb0] sm:$0xff] }
  0x32   : > { %1988 = vmatprep.subr.bf16.mxu1 %v2334_v45  ;;  %1956 = vmatprep.subr.bf16.mxu0 %v2334_v45  ;;  %v1524_v15 = vld [vmem:[%s2321_s21 + $0xb8] sm:$0xff]  ;;  %v1530_v16 = vld [vmem:[%s2321_s21 + $0xc0] sm:$0xff]  ;;  %v1531_v17 = vld [vmem:[%s2321_s21 + $0xc8] sm:$0xff] }
  0x33   : > { %v1532_v18 = vld [vmem:[%s2321_s21 + $0xd0] sm:$0xff]  ;;  %v1533_v19 = vld [vmem:[%s2321_s21 + $0xd8] sm:$0xff]  ;;  %v1534_v20 = vld [vmem:[%s2321_s21 + $0xe0] sm:$0xff] }
  0x34   : > { %v1535_v21 = vld [vmem:[%s2321_s21 + $0xe8] sm:$0xff]  ;;  %v1536_v22 = vld [vmem:[%s2321_s21 + $0xf0] sm:$0xff]  ;;  %v1537_v23 = vld [vmem:[%s2321_s21 + $0xf8] sm:$0xff] }
  0x35   : > { %1990 = vmatpush3.bf16.msra.mxu1 %v2334_v45  ;;  %1958 = vmatpush3.bf16.msra.mxu0 %v2334_v45  ;;  %v2121_v24 = vld [vmem:[%s2514_s2 + $0x8] sm:$0xff]   ;;  %v2122_v25 = vld [vmem:[%s2514_s2] sm:$0xff]   ;;  %v2124_v26 = vld [vmem:[%s2514_s2 + $0x18] sm:$0xff]  }
  0x36   : > { %1992 = vmatprep.subr.bf16.mxu1 %v2346_v48  ;;  %1960 = vmatprep.subr.bf16.mxu0 %v2346_v48  ;;  %v2123_v39 = vld [vmem:[%s2514_s2 + $0x10] sm:$0xff]  }
  0x39   : > { %1994 = vmatpush3.bf16.msra.mxu1 %v2346_v48  ;;  %1962 = vmatpush3.bf16.msra.mxu0 %v2346_v48 }
  0x3a   : > { %1996 = vmatprep.subr.bf16.mxu1 %v2364_v53  ;;  %1964 = vmatprep.subr.bf16.mxu0 %v2364_v53 }
  0x3d   : > { %1998 = vmatpush3.bf16.msra.mxu1 %v2364_v53  ;;  %1966 = vmatpush3.bf16.msra.mxu0 %v2364_v53 }
  0x3e   : > { %2000 = vmatprep.subr.bf16.mxu1 %v2370_v54  ;;  %1968 = vmatprep.subr.bf16.mxu0 %v2370_v54 }
  0x41   : > { %2002 = vmatpush3.bf16.msra.mxu1 %v2370_v54  ;;  %1970 = vmatpush3.bf16.msra.mxu0 %v2370_v54 }
  0x42   : > { %2004 = vmatprep.subr.bf16.mxu1 %v2382_v57  ;;  %1972 = vmatprep.subr.bf16.mxu0 %v2382_v57 }
  0x45   : > { %2006 = vmatpush3.bf16.msra.mxu1 %v2382_v57  ;;  %1974 = vmatpush3.bf16.msra.mxu0 %v2382_v57 }
  0x46   : > { %2008 = vmatprep.subr.bf16.mxu1 %v2300_v35  ;;  %1803 = vmatprep.subr.bf16.mxu0 %v2121_v24 }
  0x48   : > { %1792 = vmatmul.mubr.f32.vlgmr.msra.gmra.mrb[0].mxu1 %v1500_v58  ;;  %1748 = vmatmul.mubr.f32.vlgmr.msra.gmra.mrb[0].mxu0 %v439_v59 }
  0x49   : > { %2010 = vmatpush3.bf16.msra.mxu1 %v2300_v35  ;;  %1794 = vmatprep.mubr.f32.mxu1 %v1501_v60 }
  0x4a   : > { %2012 = vmatprep.subr.bf16.mxu1 %v2305_v37  ;;  %1750 = vmatprep.mubr.f32.mxu0 %v440_v61 }
  0x4b   : > { %1804 = vmatpush3.bf16.msra.mxu0 %v2121_v24 }
  0x4c   : > { %1795 = vmatmul.mubr.f32.gmra.mrb[2].mxu1 %v1502_v62  ;;  %1751 = vmatmul.mubr.f32.gmra.mrb[2].mxu0 %v441_v63 }
  0x4d   : > { %2014 = vmatpush3.bf16.msra.mxu1 %v2305_v37  ;;  %1797 = vmatprep.mubr.f32.mxu1 %v1503_v0 }
  0x4e   : > { %2016 = vmatprep.subr.bf16.mxu1 %v2318_v40  ;;  %1753 = vmatprep.mubr.f32.mxu0 %v442_v1 }
  0x4f   : > { %1813 = vmatprep.subr.bf16.mxu0 %v2122_v25 }
  0x50   : > { %1798 = vmatmul.mubr.f32.gmra.mrb[4].mxu1 %v1504_v2  ;;  %1754 = vmatmul.mubr.f32.gmra.mrb[4].mxu0 %v443_v3 }
  0x51   : > { %2018 = vmatpush3.bf16.msra.mxu1 %v2318_v40  ;;  %1800 = vmatprep.mubr.f32.mxu1 %v1505_v4 }
  0x52   : > { %2020 = vmatprep.subr.bf16.mxu1 %v2334_v45  ;;  %1756 = vmatprep.mubr.f32.mxu0 %v444_v5 }
  0x54   : > { %1801 = vmatmul.mubr.f32.gmra.mrb[6].mxu1 %v1506_v6  ;;  %1757 = vmatmul.mubr.f32.gmra.mrb[6].mxu0 %v445_v7 }
  0x55   : > { %2022 = vmatpush3.bf16.msra.mxu1 %v2334_v45  ;;  %1855 = vmatprep.mubr.f32.mxu1 %v1517_v8 }
  0x56   : > { %2024 = vmatprep.subr.bf16.mxu1 %v2346_v48 }
  0x59   : > { %2026 = vmatpush3.bf16.msra.mxu1 %v2346_v48 }
  0x5a   : > { %2028 = vmatprep.subr.bf16.mxu1 %v2364_v53 }
  0x5d   : > { %2030 = vmatpush3.bf16.msra.mxu1 %v2364_v53 }
  0x5e   : > { %2032 = vmatprep.subr.bf16.mxu1 %v2370_v54 }
  0x61   : > { %2034 = vmatpush3.bf16.msra.mxu1 %v2370_v54 }
  0x62   : > { %2036 = vmatprep.subr.bf16.mxu1 %v2382_v57 }
  0x65   : > { %2038 = vmatpush3.bf16.msra.mxu1 %v2382_v57 }
  0x66   : > { %2040 = vmatprep.subr.bf16.mxu1 %v2300_v35 }
  0x68   : > { %1856 = vmatmul.mubr.f32.vlgmr.msra.gmra.mrb[8].mxu1 %v1518_v9 }
  0x69   : > { %2042 = vmatpush3.bf16.msra.mxu1 %v2300_v35  ;;  %1858 = vmatprep.mubr.f32.mxu1 %v1519_v10 }
  0x6a   : > { %2044 = vmatprep.subr.bf16.mxu1 %v2305_v37 }
  0x6c   : > { %1859 = vmatmul.mubr.f32.gmra.mrb[10].mxu1 %v1520_v11 }
  0x6d   : > { %2046 = vmatpush3.bf16.msra.mxu1 %v2305_v37  ;;  %1861 = vmatprep.mubr.f32.mxu1 %v1521_v12  ;;  %v2125_v12 = vld [vmem:[%s2516_s4] sm:$0xff]  }
  0x6e   : > { %2048 = vmatprep.subr.bf16.mxu1 %v2318_v40 }
  0x70   : > { %1862 = vmatmul.mubr.f32.gmra.mrb[12].mxu1 %v1522_v13  ;;  %v2126_v13 = vld [vmem:[%s2516_s4 + $0x8] sm:$0xff]  }
  0x71   : > { %2050 = vmatpush3.bf16.msra.mxu1 %v2318_v40  ;;  %1864 = vmatprep.mubr.f32.mxu1 %v1523_v14 }
  0x72   : > { %2052 = vmatprep.subr.bf16.mxu1 %v2334_v45 }
  0x74   : > { %1865 = vmatmul.mubr.f32.gmra.mrb[14].mxu1 %v1524_v15 }
  0x75   : > { %2054 = vmatpush3.bf16.msra.mxu1 %v2334_v45  ;;  %1909 = vmatprep.mubr.f32.mxu1 %v1530_v16 }
  0x76   : > { %2056 = vmatprep.subr.bf16.mxu1 %v2346_v48 }
  0x79   : > { %2058 = vmatpush3.bf16.msra.mxu1 %v2346_v48 }
  0x7a   : > { %2060 = vmatprep.subr.bf16.mxu1 %v2364_v53 }
  0x7d   : > { %2062 = vmatpush3.bf16.msra.mxu1 %v2364_v53 }
  0x7e   : > { %2064 = vmatprep.subr.bf16.mxu1 %v2370_v54 }
  0x81   : > { %2066 = vmatpush3.bf16.msra.mxu1 %v2370_v54 }
  0x82   : > { %2068 = vmatprep.subr.bf16.mxu1 %v2382_v57 }
  0x85   : > { %2070 = vmatpush3.bf16.msra.mxu1 %v2382_v57 }
  0x86   : > { %2071 = vmatprep.subr.bf16.mxu1 %v2124_v26 }
  0x88   : > { %1910 = vmatmul.mubr.f32.vlgmr.msra.gmra.mrb[16].mxu1 %v1531_v17 }
  0x89   : > { %1912 = vmatprep.mubr.f32.mxu1 %v1532_v18  ;;  %2072 = vmatpush3.bf16.msra.mxu1 %v2124_v26  ;;  %v1543_v18 = vld [vmem:[%s2515_s3] ss:$0 sm:$0xff] }
  0x8c   : > { %1913 = vmatmul.mubr.f32.gmra.mrb[18].mxu1 %v1533_v19 }
  0x8d   : > { %1915 = vmatprep.mubr.f32.mxu1 %v1534_v20 }
  0x90   : > { %1916 = vmatmul.mubr.f32.gmra.mrb[20].mxu1 %v1535_v21 }
  0x91   : > { %1918 = vmatprep.mubr.f32.mxu1 %v1536_v22 }
  0x94   : > { %1919 = vmatmul.mubr.f32.gmra.mrb[22].mxu1 %v1537_v23 }
 0x11b   : > { %v1793_v27 = vpop.f32.mrb[0].mxu1  ;;  %v1749_v28 = vpop.f32.mrb[0].mxu0 }
 0x11c   : > { %v630_v29 = vpop.f32.mrb[1].mxu1  ;;  %v512_v30 = vpop.f32.mrb[1].mxu0 }
 0x11d   : > { %v669_v31 = vpack.c.bf16 %v1793_v27, %v630_v29  ;;  %v551_v32 = vpack.c.bf16 %v1749_v28, %v512_v30 }
 0x11f   : > { %v1796_v33 = vpop.f32.mrb[2].mxu1  ;;  %1805 = vmatprep.mubr.msk.bf16.mxu0 %vm679_vm0, %v669_v31  ;;  %v1752_v34 = vpop.f32.mrb[2].mxu0 }
 0x120   : > { %v640_v35 = vpop.f32.mrb[3].mxu1  ;;  %v522_v36 = vpop.f32.mrb[3].mxu0 }
 0x121   : > { %v670_v37 = vpack.c.bf16 %v1796_v33, %v640_v35  ;;  %v552_v38 = vpack.c.bf16 %v1752_v34, %v522_v36 }
 0x123   : > { %1806 = vmatmul.mubr.msk.bf16.vlgmr.msra.gmra.mrb[8].mxu0 %vm679_vm0, %v670_v37  ;;  %v1799_v40 = vpop.f32.mrb[4].mxu1  ;;  %v1755_v41 = vpop.f32.mrb[4].mxu0 }
 0x124   : > { %v650_v42 = vpop.f32.mrb[5].mxu1  ;;  %1814 = vmatpush3.bf16.msra.mxu0 %v2122_v25  ;;  %v532_v43 = vpop.f32.mrb[5].mxu0 }
 0x125   : > { %v671_v44 = vpack.c.bf16 %v1799_v40, %v650_v42  ;;  %v553_v45 = vpack.c.bf16 %v1755_v41, %v532_v43  ;;  %1867 = vmatprep.subr.bf16.mxu0 %v2123_v39 }
 0x127   : > { %v1802_v46 = vpop.f32.mrb[6].mxu1  ;;  %1809 = vmatprep.mubr.msk.bf16.mxu0 %vm679_vm0, %v671_v44  ;;  %v1758_v47 = vpop.f32.mrb[6].mxu0 }
 0x128   : > { %v660_v48 = vpop.f32.mrb[7].mxu1  ;;  %v542_v49 = vpop.f32.mrb[7].mxu0 }
 0x129   : > { %v672_v50 = vpack.c.bf16 %v1802_v46, %v660_v48  ;;  %v554_v51 = vpack.c.bf16 %v1758_v47, %v542_v49 }
 0x12b   : > { %1810 = vmatmul.mubr.msk.bf16.gmra.mrb[12].mxu0 %vm679_vm0, %v672_v50 }
 0x12c   : > { %1815 = vmatprep.mubr.msk.bf16.mxu0 %vm679_vm0, %v551_v32 }
 0x133   : > { %1816 = vmatmul.mubr.msk.bf16.vlgmr.msra.gmra.mrb[8].mxu0 %vm679_vm0, %v552_v38 }
 0x134   : > { %1819 = vmatprep.mubr.msk.bf16.mxu0 %vm679_vm0, %v553_v45  ;;  %1868 = vmatpush3.bf16.msra.mxu0 %v2123_v39 }
 0x135   : > { %1921 = vmatprep.subr.bf16.mxu0 %v2124_v26 }
 0x13b   : > { %1820 = vmatmul.mubr.msk.bf16.gmra.mrb[12].mxu0 %vm679_vm0, %v554_v51  ;;  %v1857_v52 = vpop.f32.mrb[8].mxu1 }
 0x13c   : > { %v915_v53 = vpop.f32.mrb[9].mxu1 }
 0x13d   : > { %v954_v54 = vpack.c.bf16 %v1857_v52, %v915_v53  ;;  %v1544_v52 = vld [vmem:[%s2517_s5] ss:$0 sm:$0xff] }
 0x13f   : > { %v1860_v55 = vpop.f32.mrb[10].mxu1  ;;  %1869 = vmatprep.mubr.msk.bf16.mxu0 %vm679_vm0, %v954_v54 }
 0x140   : > { %v925_v56 = vpop.f32.mrb[11].mxu1 }
 0x141   : > { %v955_v57 = vpack.c.bf16 %v1860_v55, %v925_v56 }
 0x143   : > { %1870 = vmatmul.mubr.msk.bf16.vlgmr.msra.gmra.mrb[8].mxu0 %vm679_vm0, %v955_v57  ;;  %v1863_v58 = vpop.f32.mrb[12].mxu1 }
 0x144   : > { %v935_v59 = vpop.f32.mrb[13].mxu1  ;;  %1922 = vmatpush3.bf16.msra.mxu0 %v2124_v26 }
 0x145   : > { %v956_v60 = vpack.c.bf16 %v1863_v58, %v935_v59  ;;  %1931 = vmatprep.subr.bf16.mxu0 %v2125_v12 }
 0x147   : > { %v1866_v61 = vpop.f32.mrb[14].mxu1  ;;  %1873 = vmatprep.mubr.msk.bf16.mxu0 %vm679_vm0, %v956_v60 }
 0x148   : > { %v945_v62 = vpop.f32.mrb[15].mxu1 }
 0x149   : > { %v957_v63 = vpack.c.bf16 %v1866_v61, %v945_v62 }
 0x14b   : > { %1874 = vmatmul.mubr.msk.bf16.gmra.mrb[12].mxu0 %vm679_vm0, %v957_v63 }
 0x15b   : > { %v1911_v0 = vpop.f32.mrb[16].mxu1 }
 0x15c   : > { %v1124_v1 = vpop.f32.mrb[17].mxu1 }
 0x15d   : > { %v1163_v2 = vpack.c.bf16 %v1911_v0, %v1124_v1 }
 0x15f   : > { %v1914_v3 = vpop.f32.mrb[18].mxu1  ;;  %1923 = vmatprep.mubr.msk.bf16.mxu0 %vm679_vm0, %v1163_v2 }
 0x160   : > { %v1134_v4 = vpop.f32.mrb[19].mxu1 }
 0x161   : > { %v1164_v5 = vpack.c.bf16 %v1914_v3, %v1134_v4 }
 0x163   : > { %v1917_v6 = vpop.f32.mrb[20].mxu1  ;;  %1924 = vmatmul.mubr.msk.bf16.vlgmr.msra.gmra.mrb[8].mxu0 %vm679_vm0, %v1164_v5 }
 0x164   : > { %v1144_v7 = vpop.f32.mrb[21].mxu1  ;;  %1932 = vmatpush3.bf16.msra.mxu0 %v2125_v12 }
 0x165   : > { %v1165_v8 = vpack.c.bf16 %v1917_v6, %v1144_v7  ;;  %1933 = vmatprep.subr.bf16.mxu0 %v2126_v13 }
 0x167   : > { %v1920_v9 = vpop.f32.mrb[22].mxu1  ;;  %1927 = vmatprep.mubr.msk.bf16.mxu1 %vm679_vm0, %v1165_v8 }
 0x168   : > { %v1154_v10 = vpop.f32.mrb[23].mxu1  ;;  %1934 = vmatpush3.bf16.msra.mxu0 %v2126_v13 }
 0x169   : > { %v1166_v11 = vpack.c.bf16 %v1920_v9, %v1154_v10 }
 0x16b   : > { %1928 = vmatmul.mubr.msk.bf16.vlgmr.msra.gmra.mrb[24].mxu1 %vm679_vm0, %v1166_v11 }
 0x21e   : > { %v1875_v14 = vpop.f32.mrb[12].mxu0 }
 0x21f   : > { %v1026_v15 = vpop.f32.mrb[13].mxu0 }
 0x220   : > { %v1876_v16 = vpop.f32.mrb[14].mxu0 }
 0x221   : > { %v1029_v17 = vpop.f32.mrb[15].mxu0 }
 0x236   : > { %v1925_v19 = vpop.f32.mrb[8].mxu0 }
 0x237   : > { %v1267_v20 = vadd.f32 %v1925_v19, %v1543_v18  ;;  %v1219_v21 = vpop.f32.mrb[9].mxu0 }
 0x238   : > { %v1265_v22 = vadd.f32 %v1543_v18, %v1219_v21  ;;  %v1926_v23 = vpop.f32.mrb[10].mxu0 }
 0x239   : > { %v1268_v24 = vadd.f32 %v1926_v23, %v1543_v18  ;;  %v1222_v25 = vpop.f32.mrb[11].mxu0  ;;  %v1275_v27 = vmax.f32 %v1267_v20, 0.0 }
 0x23a   : > { %v1266_v26 = vadd.f32 %v1543_v18, %v1222_v25  ;;  %v1273_v29 = vmax.f32 %v1265_v22, 0.0 }
 0x23b   : > { %v1276_v28 = vmax.f32 %v1268_v24, 0.0 }
 0x23c   : > { %v1274_v30 = vmax.f32 %v1266_v26, 0.0 }
 0x23d   : > { %v1282_v31 = vpack.c.bf16 %v1276_v28, %v1275_v27 }
 0x23e   : > { %v1281_v32 = vpack.c.bf16 %v1274_v30, %v1273_v29  ;;  %v1929_v33 = vpop.f32.mrb[24].mxu1 }
 0x23f   : > { %v2073_v34 = vadd.f32 %v1929_v33, %v1875_v14  ;;  %v1235_v35 = vpop.f32.mrb[25].mxu1 }
 0x240   : > { %v2074_v36 = vadd.f32 %v1235_v35, %v1026_v15  ;;  %v1930_v37 = vpop.f32.mrb[26].mxu1  ;;  %1935 = vmatprep.mubr.msk.bf16.mxu0 %vm1308_vm1, %v1281_v32 }
 0x241   : > { %v1271_v38 = vadd.f32 %v2073_v34, %v1543_v18  ;;  %v2075_v39 = vadd.f32 %v1930_v37, %v1876_v16  ;;  %v1238_v40 = vpop.f32.mrb[27].mxu1  ;;  %1936 = vmatmul.mubr.msk.bf16.vlgmr.msra.gmra.mrb[16].mxu0 %vm1308_vm1, %v1282_v31 }
 0x242   : > { %v1269_v41 = vadd.f32 %v2074_v36, %v1543_v18  ;;  %v2076_v42 = vadd.f32 %v1238_v40, %v1029_v17 }
 0x243   : > { %v1272_v43 = vadd.f32 %v2075_v39, %v1543_v18  ;;  %v1279_v45 = vmax.f32 %v1271_v38, 0.0 }
 0x244   : > { %v1270_v44 = vadd.f32 %v2076_v42, %v1543_v18  ;;  %v1277_v47 = vmax.f32 %v1269_v41, 0.0 }
 0x245   : > { %v1280_v46 = vmax.f32 %v1272_v43, 0.0 }
 0x246   : > { %v1278_v48 = vmax.f32 %v1270_v44, 0.0 }
 0x247   : > { %v1284_v49 = vpack.c.bf16 %v1280_v46, %v1279_v45 }
 0x248   : > { %v1283_v50 = vpack.c.bf16 %v1278_v48, %v1277_v47 }
 0x24a   : > { %1939 = vmatprep.mubr.msk.bf16.mxu0 %vm1308_vm1, %v1283_v50 }
 0x24b   : > { %1940 = vmatmul.mubr.msk.bf16.gmra.mrb[20].mxu0 %vm1308_vm1, %v1284_v49 }
 0x314   : > { %v1937_v51 = vpop.f32.mrb[16].mxu0 }
 0x315   : > { %v1355_v53 = vpop.f32.mrb[17].mxu0  ;;  %v1364_v55 = vadd.f32 %v1937_v51, %v1544_v52 }
 0x316   : > { %v1938_v54 = vpop.f32.mrb[18].mxu0  ;;  %v1356_v58 = vadd.f32 %v1544_v52, %v1355_v53 }
 0x317   : > { %v1367_v56 = vadd.f32 %v1938_v54, %v1544_v52  ;;  %v1358_v57 = vpop.f32.mrb[19].mxu0 }
 0x318   : > { %v1359_v59 = vadd.f32 %v1544_v52, %v1358_v57 }
 0x319   : > { %v1578_v60 = vpack.c.bf16 %v1367_v56, %v1364_v55 }
 0x31a   : > { %v1573_v61 = vpack.c.bf16 %v1359_v59, %v1356_v58 }
 0x31b   : > { %1590 = vst [vmem:[%s411_s11 + $0x8] sm:$0xff] %v1578_v60  }
 0x31c   : > { %1574 = vst [vmem:[%s411_s11] sm:$0xff] %v1573_v61  }
 0x31e   : > { %v1941_v62 = vpop.f32.mrb[20].mxu0 }
 0x31f   : > { %v1371_v63 = vpop.f32.mrb[21].mxu0  ;;  %v1380_v1 = vadd.f32 %v1941_v62, %v1544_v52 }
 0x320   : > { %v1942_v0 = vpop.f32.mrb[22].mxu0  ;;  %v1372_v4 = vadd.f32 %v1544_v52, %v1371_v63 }
 0x321   : > { %v1383_v2 = vadd.f32 %v1942_v0, %v1544_v52  ;;  %v1374_v3 = vpop.f32.mrb[23].mxu0 }
 0x322   : > { %v1375_v5 = vadd.f32 %v1544_v52, %v1374_v3 }
 0x323   : > { %v1588_v6 = vpack.c.bf16 %v1383_v2, %v1380_v1 }
 0x324   : > { %v1583_v7 = vpack.c.bf16 %v1375_v5, %v1372_v4 }
 0x325   : > { %1592 = vst [vmem:[%s411_s11 + $0x18] sm:$0xff] %v1588_v6  }
 0x326   : > { %1591 = vst [vmem:[%s411_s11 + $0x10] sm:$0xff] %v1583_v7  }
 0x327 PF: > { %p13_p9 = scmp.ge.s32.totalorder %s2203_s25, 4   ;;  %s2519_s21 = smov %s2145_s22 }
 0x328   : > { %s2520_s22 = smov %s2212_s28  ;;  %s2521_s23 = smov %s2203_s25 }
 0x329   :  { %15 = sbr.rel (!%p13_p9) target bundleno = 2 (0x2), region = 120 }

</bundles_post_ra>
